<compile_context>
chip_gen: v5e
topology: v5e:2x2
jax: 0.10.0
libtpu: 0.0.40
codegen_flags: <defaults>
</compile_context>

<pallas_src>
import jax
import jax.numpy as jnp
from jax.experimental import pallas as pl
from jax.experimental.pallas import tpu as pltpu


def _round_up(x, m):
    return ((x + m - 1) // m) * m


# ---------------------------------------------------------------------------
# Pallas kernel: one TILE_M-row slab of the linear probe
#   x_ref: (TILE_M, H) bf16 (or f32 — cast in-register)
#   w_ref: (H, Lp) bf16      b_ref: (1, Lp) f32
#   o_ref: (TILE_M, Lp) bf16
# ---------------------------------------------------------------------------
def probe_kernel(x_ref, w_ref, b_ref, o_ref):
    x = x_ref[...].astype(jnp.bfloat16)          # no-op when already bf16
    acc = jnp.dot(x, w_ref[...], preferred_element_type=jnp.float32)
    o_ref[...] = (acc + b_ref[...]).astype(o_ref.dtype)


def linear_probe(word_rep, w, b, *, tile_m=1024, out_dtype=jnp.bfloat16):
    """word_rep: [B, S, H], w: [H, L] f32, b: [L] f32 -> [B, S, L] out_dtype."""
    B, S, H = word_rep.shape
    L = w.shape[1]
    M = B * S

    # Lane-dense output: pad label dim up to exactly a multiple of 128.
    L_pad = _round_up(L, 128)

    # Row tile: multiple of 16 (bf16 sublane packing), capped at ~M/2 so the
    # parallel grid axis has >= 2 blocks whenever M allows (v7x megacore),
    # and clamped for tiny inputs.  No M padding — last block is ragged.
    half = _round_up(pl.cdiv(M, 2), 16)
    tile = max(16, min(tile_m, half))
    tile = min(tile, _round_up(M, 16))
    grid = (pl.cdiv(M, tile),)

    # Contiguous reshape (no copy); dtype is whatever the producer emitted.
    x2d = word_rep.reshape(M, H)
    w_p = jnp.pad(w, ((0, 0), (0, L_pad - L))).astype(jnp.bfloat16)
    b_p = jnp.pad(b, (0, L_pad - L)).reshape(1, L_pad).astype(jnp.float32)

    cost = pl.CostEstimate(
        flops=2 * M * H * L_pad,
        transcendentals=0,
        bytes_accessed=(M * H * x2d.dtype.itemsize        # x stream
                        + H * L_pad * 2                   # W (bf16, resident)
                        + L_pad * 4                       # b (f32, resident)
                        + M * L_pad * jnp.dtype(out_dtype).itemsize),  # out
    )

    # VMEM @ tile=1024, H=1280: x 2.5MiB*2 + out 0.25MiB*2 + W 0.3MiB ≈ 6 MiB
    # — fits even v5e's 16 MiB scoped default, so no vmem_limit_bytes needed.
    out = pl.pallas_call(
        probe_kernel,
        out_shape=jax.ShapeDtypeStruct((M, L_pad), out_dtype),
        grid_spec=pltpu.PrefetchScalarGridSpec(
            num_scalar_prefetch=0,
            grid=grid,
            in_specs=[
                pl.BlockSpec((tile, H), lambda i: (i, 0)),   # x: streamed
                pl.BlockSpec((H, L_pad), lambda i: (0, 0)),  # W: resident
                pl.BlockSpec((1, L_pad), lambda i: (0, 0)),  # b: resident
            ],
            out_specs=pl.BlockSpec((tile, L_pad), lambda i: (i, 0)),
        ),
        compiler_params=pltpu.CompilerParams(
            dimension_semantics=("parallel",)),
        cost_estimate=cost,
    )(x2d, w_p, b_p)

    # Only the (small) label slice remains; no row slice is needed since
    # there is no M padding.
    return out[:, :L].reshape(B, S, L)


# ---------------------------------------------------------------------------
# Deterministic stub for the frozen XLM encoder (plain JAX glue).
# Emits word_rep in bf16 so the probe kernel's x stream is half-width and
# the cast fuses into the tanh epilogue (no standalone cast pass).
# TODO(synk): the real pretrained XLM-100-1280 transformer stack is not
#             reproduced here; this stub only matches output shape/dtype
#             semantics of `self.bert(sentences, return_dict=False)[0]`.
# ---------------------------------------------------------------------------
def stub_frozen_encoder(token_ids, params):
    emb = params["tok_emb"][token_ids]                   # [B, S, H]
    pos = params["pos_emb"][: token_ids.shape[1]]        # [S, H]
    h = jnp.tanh((emb + pos[None, :, :]) @ params["enc_w"] + params["enc_b"])
    h = h.astype(jnp.bfloat16)                           # fused into producer
    # `with torch.no_grad()` on the frozen encoder:
    return jax.lax.stop_gradient(h)


def linear_probe_xlm_adapter_forward(token_ids, params):
    word_rep = stub_frozen_encoder(token_ids, params)    # (sentence_rep ignored)
    return linear_probe(word_rep, params["probe_w"], params["probe_b"])


# ---------------------------------------------------------------------------
# main
# ---------------------------------------------------------------------------
if __name__ == "__main__":
    # small shapes consistent with the module semantics
    B, S, H = 2, 8, 32        # batch, seq, hidden (real model uses H=1280)
    VOCAB = 64
    NUM_LABELS = 8

    key = jax.random.PRNGKey(0)
    k1, k2, k3, k4, k5, k6, k7 = jax.random.split(key, 7)

    params = {
        "tok_emb": jax.random.normal(k1, (VOCAB, H), jnp.float32) * 0.02,
        "pos_emb": jax.random.normal(k2, (S, H), jnp.float32) * 0.02,
        "enc_w":   jax.random.normal(k3, (H, H), jnp.float32) * 0.1,
        "enc_b":   jax.random.normal(k4, (H,), jnp.float32) * 0.01,
        # probe = nn.Linear(hidden_size, num_labels)
        "probe_w": jax.random.normal(k5, (H, NUM_LABELS), jnp.float32) * 0.1,
        "probe_b": jax.random.normal(k6, (NUM_LABELS,), jnp.float32) * 0.01,
    }

    token_ids = jax.random.randint(k7, (B, S), 0, VOCAB, dtype=jnp.int32)

    logits = linear_probe_xlm_adapter_forward(token_ids, params)
    jax.block_until_ready(logits)
    assert logits.shape == (B, S, NUM_LABELS)

    # reference checks against plain JAX
    word_rep = stub_frozen_encoder(token_ids, params)    # bf16
    logits_f32 = logits.astype(jnp.float32)

    # (a) tight check vs. a bf16-input / f32-accumulate reference (matches
    #     the kernel's arithmetic up to bf16 output rounding)
    ref_bf16 = (jnp.dot(word_rep, params["probe_w"].astype(jnp.bfloat16),
                        preferred_element_type=jnp.float32)
                + params["probe_b"])
    assert jnp.allclose(logits_f32, ref_bf16, atol=2e-2, rtol=2e-2)

    # (b) loose sanity check vs. the full-f32 reference (bf16 trade-off)
    ref_f32 = word_rep.astype(jnp.float32) @ params["probe_w"] + params["probe_b"]
    assert jnp.allclose(logits_f32, ref_f32, atol=5e-2, rtol=5e-2)

    print("KERNEL_OK")
</pallas_src>

<mosaic_0001>
module attributes {stable_mosaic.version = 11 : i64} {
  func.func @probe_kernel(%arg0: i32, %arg1: memref<16x32xbf16, #tpu.memory_space<vmem>>, %arg2: memref<32x128xbf16, #tpu.memory_space<vmem>>, %arg3: memref<1x128xf32, #tpu.memory_space<vmem>>, %arg4: memref<16x128xbf16, #tpu.memory_space<vmem>>) attributes {dimension_semantics = [#tpu.dimension_semantics<parallel>], iteration_bounds = array<i64: 1>, scalar_prefetch = 0 : i64, scratch_operands = 0 : i64, tpu.core_type = #tpu.core_type<tc>, window_params = [{transform_indices = @transform_0, window_bounds = array<i64: 16, 32>}, {pipeline_mode = #tpu.pipeline_mode<synchronous>, transform_indices = @transform_1, window_bounds = array<i64: 32, 128>}, {pipeline_mode = #tpu.pipeline_mode<synchronous>, transform_indices = @transform_2, window_bounds = array<i64: 1, 128>}, {transform_indices = @transform_3, window_bounds = array<i64: 16, 128>}]} {
    %c0 = arith.constant 0 : index
    %c0_0 = arith.constant 0 : index
    %0 = vector.load %arg1[%c0, %c0_0] : memref<16x32xbf16, #tpu.memory_space<vmem>>, vector<16x32xbf16>
    %c0_1 = arith.constant 0 : index
    %c0_2 = arith.constant 0 : index
    %1 = vector.load %arg2[%c0_1, %c0_2] : memref<32x128xbf16, #tpu.memory_space<vmem>>, vector<32x128xbf16>
    %cst = arith.constant dense<0.000000e+00> : vector<16x128xf32>
    %2 = tpu.matmul %0, %1, %cst {dimension_numbers = #tpu.dot_dimension_numbers<[1], [0], [0], [1], [0, 0, 1, 1], [], []>} : vector<16x32xbf16>, vector<32x128xbf16>, vector<16x128xf32> -> vector<16x128xf32>
    %c0_3 = arith.constant 0 : index
    %c0_4 = arith.constant 0 : index
    %3 = vector.load %arg3[%c0_3, %c0_4] : memref<1x128xf32, #tpu.memory_space<vmem>>, vector<1x128xf32>
    %4 = vector.broadcast %3 : vector<1x128xf32> to vector<16x128xf32>
    %5 = arith.addf %2, %4 : vector<16x128xf32>
    %6 = arith.truncf %5 : vector<16x128xf32> to vector<16x128xbf16>
    %c0_5 = arith.constant 0 : index
    %c0_6 = arith.constant 0 : index
    %7 = vector.load %arg4[%c0_5, %c0_6] : memref<16x128xbf16, #tpu.memory_space<vmem>>, vector<16x128xbf16>
    tpu.vector_store %arg4[%c0_5, %c0_6], %6 {strides = array<i32>} : memref<16x128xbf16, #tpu.memory_space<vmem>>, vector<16x128xbf16>,
    return
  }
  func.func @transform_0(%arg0: i32) -> (i32, i32) {
    %c0_i32 = arith.constant 0 : i32
    %c0_i32_0 = arith.constant 0 : i32
    return %arg0, %c0_i32 : i32, i32
  }
  func.func @transform_1(%arg0: i32) -> (i32, i32) {
    %c0_i32 = arith.constant 0 : i32
    %c0_i32_0 = arith.constant 0 : i32
    %c0_i32_1 = arith.constant 0 : i32
    return %c0_i32, %c0_i32_0 : i32, i32
  }
  func.func @transform_2(%arg0: i32) -> (i32, i32) {
    %c0_i32 = arith.constant 0 : i32
    %c0_i32_0 = arith.constant 0 : i32
    %c0_i32_1 = arith.constant 0 : i32
    return %c0_i32, %c0_i32_0 : i32, i32
  }
  func.func @transform_3(%arg0: i32) -> (i32, i32) {
    %c0_i32 = arith.constant 0 : i32
    %c0_i32_0 = arith.constant 0 : i32
    return %arg0, %c0_i32 : i32, i32
  }
}

</mosaic_0001>

<bundles_post_ra>
// kernel: tpu_custom_call.1
= control target key start
LH: loop header
LB: loop body
LE: loop exit
PB: predicated region body
PF: predicated region fallthrough
CT: control target
= control target key end

     0   :  { %8 = vsyncpa [#allocation3], 0  ;;  %s268_s0 = inlined_call_operand.hbm [shape: bf16[16,32], index: 0, kind: input, shape index: {}]   ;;  %s269_s1 = inlined_call_operand.hbm [shape: bf16[32,128], index: 1, kind: input, shape index: {}]   ;;  %s270_s2 = inlined_call_operand.vmem [shape: f32[1,128], index: 2, kind: input, shape index: {}]   ;;  %s271_s3 = inlined_call_operand.hbm [shape: bf16[16,128], index: 3, kind: output, shape index: {}]  }
   0x1   :  { %9 = vsyncpa [#allocation6], 0 }
   0x2   :  { %10 = vsyncpa [#allocation4], 0  ;;  %s15_s14 = sshll.u32 %s268_s0, 4  ;;  %s222_s15 = smov [#allocation2]   ;;  %s16_s14 = int_to_ptr.hbm [resolvable:$true] %s15_s14 }
   0x3   :  { %s17_s16 = sshll.u32 %s222_s15, 4  ;;  %s28_s19 = sshll.u32 %s269_s1, 4  ;;  %s18_s16 = int_to_ptr.vmem [resolvable:$true] %s17_s16  ;;  %s29_s19 = int_to_ptr.hbm [resolvable:$true] %s28_s19 }
   0x4   :  { %s223_s20 = smov 64   ;;  %s224_s21 = smov 4  }
   0x5   :  { %23 = dma.hbm_to_vmem [thread:$0]  %s16_s14, 128, %s18_s16, [#allocation3], %s223_s20, %s223_s20, %s224_s21  }
   0x6   :  { %s225_s22 = smov [#allocation5]  }
   0x7   :  { %s30_s23 = sshll.u32 %s225_s22, 4  ;;  %s31_s23 = int_to_ptr.vmem [resolvable:$true] %s30_s23 }
   0x8   :  { %36 = dma.hbm_to_vmem [thread:$0]  %s29_s19, 256, %s31_s23, [#allocation6], %s223_s20, %s223_s20, %s224_s21  }
   0x9   :  { %216 = dma.done.wait [#allocation3], 128  }
   0xa   :  { %217 = vsyncadd [#allocation3], 4294967168 }
   0xb   :  { %218 = dma.done.wait [#allocation6], 256  }
   0xc   :  { %219 = vsyncadd [#allocation6], 4294967040  ;;  %v132_v0 = vld [vmem:[#allocation5 + $0x8] sm:$0xff]  ;;  %v131_v1 = vld [vmem:[#allocation5] sm:$0xff]  ;;  %vm75_vm0 = vcmask 261120   ;;  %s226_s24 = smov [#allocation7]  }
   0xd   :  { %85 = vmatpush.bf16.msra.mxu0 %v132_v0  ;;  %v130_v2 = vld [vmem:[#allocation2] sm:$0xff]  ;;  %s101_s25 = sshll.u32 %s226_s24, 4  ;;  %s103_s28 = sshll.u32 %s271_s3, 4  ;;  %s102_s25 = int_to_ptr.vmem [resolvable:$true] %s101_s25  ;;  %s104_s28 = int_to_ptr.hbm [resolvable:$true] %s103_s28 }
   0xe   :  { %v143_v4 = vld [vmem:[%s270_s2] ss:$0 sm:$0xff] }
  0x11   :  { %86 = vmatpush.bf16.msra.mxu0 %v131_v1 }
  0x14   :  { %129 = vmatmul.msk.bf16.vlgmr.msra.gmra.mxu0 %vm75_vm0, %v130_v2 }
  0x91   :  { %v88_v3 = vpop.f32.mrf.mxu0 }
  0x92   :  { %v89_v6 = vadd.f32 %v143_v4, %v88_v3 }
  0x99   :  { %v90_v5 = vpop.f32.mrf.mxu0 }
  0x9a   :  { %v91_v7 = vadd.f32 %v143_v4, %v90_v5 }
  0x9c   :  { %v136_v8 = vpack.c.bf16 %v91_v7, %v89_v6 }
  0x9e   :  { %137 = vst [vmem:[#allocation7] sm:$0xff] %v136_v8  }
  0x9f   :  { %109 = dma.vmem_to_hbm [thread:$0]  %s102_s25, 128, %s104_s28, [#allocation4], %s223_s20, %s223_s20, %s224_s21  }
  0xa0   :  { %220 = dma.done.wait [#allocation4], 128  }
  0xa1   :  { %221 = vsyncadd [#allocation4], 4294967168 }
  0xa2   :  { %114 = vsyncpa [#allocation3], 1 }
  0xa3   :  { %115 = vsyncpa [#allocation6], 1 }
  0xa4   :  { %116 = vsyncpa [#allocation4], 1 }

</bundles_post_ra>
